<compile_context>
chip_gen: v5e
topology: v5e:2x2
jax: 0.10.0
libtpu: 0.0.40
codegen_flags: <defaults>
</compile_context>

<pallas_src>
import functools

import jax
import jax.numpy as jnp
from jax.experimental import pallas as pl
from jax.experimental.pallas import tpu as pltpu

_BN_EPS = 1e-5
_LANE = 128                      # lane width: channel / K axes padded to multiples of this
_SUBLANE = 8                     # f32 sublane width: row tiles padded to multiples of this
_MAX_TILE_M = 512                # rows per grid step (multiple of 256 for v6e/v7x MXU)
_VMEM_LIMIT = 32 * 1024 * 1024   # explicit scoped-VMEM budget (safe on v5e/v6e/v7x)


def _round_up(x, m):
    return (x + m - 1) // m * m


# ------------------------------ Pallas kernels ------------------------------ #

def _matmul_stats_kernel(cols_ref, w_ref, y_ref, stats_ref):
    """Rows-tiled conv matmul (bf16 operands, f32 acc) + per-channel sum/sumsq accumulation."""
    y = jnp.dot(cols_ref[...], w_ref[...], preferred_element_type=jnp.float32)
    y_ref[...] = y

    @pl.when(pl.program_id(0) == 0)
    def _():
        stats_ref[...] = jnp.zeros_like(stats_ref)

    s = jnp.sum(y, axis=0, keepdims=True)           # (1, Cpad)
    sq = jnp.sum(y * y, axis=0, keepdims=True)      # (1, Cpad)
    stats_ref[...] += jnp.concatenate([s, sq], axis=0)


def _bn_scale_shift(stats, gamma, beta, inv_n):
    """Finalize BatchNorm(train) scale/shift from accumulated sum / sum-of-squares."""
    mean = stats[0:1, :] * inv_n
    var = jnp.maximum(stats[1:2, :] * inv_n - mean * mean, 0.0)
    scale = gamma * jax.lax.rsqrt(var + _BN_EPS)
    shift = beta - mean * scale
    return scale, shift


def _bn_act_kernel(y_ref, stats_ref, gamma_ref, beta_ref, o_ref, *, inv_n, relu):
    """Elementwise BatchNorm apply + optional ReLU on a rows tile."""
    scale, shift = _bn_scale_shift(stats_ref[...], gamma_ref[...], beta_ref[...], inv_n)
    y = y_ref[...] * scale + shift
    if relu:
        y = jnp.maximum(y, 0.0)
    o_ref[...] = y.astype(o_ref.dtype)


def _bn_add_act_kernel(y_ref, stats_ref, gamma_ref, beta_ref, res_ref, o_ref, *, inv_n, relu):
    """Elementwise BatchNorm apply + residual add + optional ReLU on a rows tile."""
    scale, shift = _bn_scale_shift(stats_ref[...], gamma_ref[...], beta_ref[...], inv_n)
    y = y_ref[...] * scale + shift + res_ref[...]
    if relu:
        y = jnp.maximum(y, 0.0)
    o_ref[...] = y.astype(o_ref.dtype)


def _maxpool_kernel(taps_ref, o_ref):
    """Max-reduction over the K*K patch axis (leading dim) on a rows tile."""
    o_ref[...] = jnp.max(taps_ref[...], axis=0).astype(o_ref.dtype)


# ------------------------------ JAX glue / ops ------------------------------ #

def _im2col(x_nhwc, kh, kw, stride, padding, pad_value=0.0):
    """Extract (kh, kw) patches -> (N*Ho*Wo, kh*kw*C)."""
    n, h, w, c = x_nhwc.shape
    xp = jnp.pad(x_nhwc, ((0, 0), (padding, padding), (padding, padding), (0, 0)),
                 constant_values=pad_value)
    ho = (h + 2 * padding - kh) // stride + 1
    wo = (w + 2 * padding - kw) // stride + 1
    patches = []
    for i in range(kh):
        for j in range(kw):
            patches.append(jax.lax.slice(
                xp, (0, i, j, 0),
                (n, i + (ho - 1) * stride + 1, j + (wo - 1) * stride + 1, c),
                (1, stride, stride, 1)))
    cols = jnp.concatenate(patches, axis=-1)            # (n, ho, wo, kh*kw*c)
    return cols.reshape(n * ho * wo, kh * kw * c), ho, wo


def _row_tiling(rows):
    tile_m = _MAX_TILE_M if rows >= _MAX_TILE_M else _round_up(rows, _SUBLANE)
    rows_pad = _round_up(rows, tile_m)
    return tile_m, rows_pad


def conv_bn_act(x_nhwc, w_oihw, gamma, beta, *, stride, padding, relu, residual=None):
    """Conv2d (no bias) + BatchNorm2d(train) [+ residual] [+ ReLU], via two tiled Pallas passes."""
    n = x_nhwc.shape[0]
    cout, cin, kh, kw = w_oihw.shape
    cols, ho, wo = _im2col(x_nhwc, kh, kw, stride, padding)
    rows, k = cols.shape

    c_pad = _round_up(cout, _LANE)
    k_pad = _round_up(k, _LANE)
    tile_m, rows_pad = _row_tiling(rows)
    grid = (rows_pad // tile_m,)

    # Lane-dense, bf16 MXU operands (zero padding keeps BN stats exact: padded rows/cols add 0).
    cols_p = jnp.pad(cols, ((0, rows_pad - rows), (0, k_pad - k))).astype(jnp.bfloat16)
    w_mat = jnp.transpose(w_oihw, (2, 3, 1, 0)).reshape(k, cout)
    w_p = jnp.pad(w_mat, ((0, k_pad - k), (0, c_pad - cout))).astype(jnp.bfloat16)
    gamma_p = jnp.pad(gamma.astype(jnp.float32).reshape(1, cout),
                      ((0, 0), (0, c_pad - cout)), constant_values=1.0)
    beta_p = jnp.pad(beta.astype(jnp.float32).reshape(1, cout),
                     ((0, 0), (0, c_pad - cout)))

    # Pass 1: tiled matmul + global batch-stat accumulation (rows axis is a reduction
    # for the resident stats block -> 'arbitrary').
    flops = 2 * rows_pad * k_pad * c_pad
    bytes_accessed = (cols_p.size * 2 + w_p.size * 2 + rows_pad * c_pad * 4)
    y_p, stats = pl.pallas_call(
        _matmul_stats_kernel,
        grid_spec=pltpu.PrefetchScalarGridSpec(
            num_scalar_prefetch=0,
            grid=grid,
            in_specs=[
                pl.BlockSpec((tile_m, k_pad), lambda i: (i, 0)),
                pl.BlockSpec((k_pad, c_pad), lambda i: (0, 0)),
            ],
            out_specs=(
                pl.BlockSpec((tile_m, c_pad), lambda i: (i, 0)),
                pl.BlockSpec((2, c_pad), lambda i: (0, 0)),
            ),
        ),
        out_shape=(
            jax.ShapeDtypeStruct((rows_pad, c_pad), jnp.float32),
            jax.ShapeDtypeStruct((2, c_pad), jnp.float32),
        ),
        compiler_params=pltpu.CompilerParams(
            dimension_semantics=("arbitrary",),
            vmem_limit_bytes=_VMEM_LIMIT),
        cost_estimate=pl.CostEstimate(flops=flops, transcendentals=0,
                                      bytes_accessed=bytes_accessed),
    )(cols_p, w_p)

    # Pass 2: elementwise BN apply (+ residual) (+ ReLU); independent across rows -> 'parallel'.
    inv_n = 1.0 / float(rows)
    if residual is None:
        kern = functools.partial(_bn_act_kernel, inv_n=inv_n, relu=relu)
        extra_inputs = []
        extra_specs = []
    else:
        res_p = jnp.pad(residual.reshape(rows, cout).astype(jnp.float32),
                        ((0, rows_pad - rows), (0, c_pad - cout)))
        kern = functools.partial(_bn_add_act_kernel, inv_n=inv_n, relu=relu)
        extra_inputs = [res_p]
        extra_specs = [pl.BlockSpec((tile_m, c_pad), lambda i: (i, 0))]

    out_p = pl.pallas_call(
        kern,
        grid_spec=pltpu.PrefetchScalarGridSpec(
            num_scalar_prefetch=0,
            grid=grid,
            in_specs=[
                pl.BlockSpec((tile_m, c_pad), lambda i: (i, 0)),   # y
                pl.BlockSpec((2, c_pad), lambda i: (0, 0)),        # stats
                pl.BlockSpec((1, c_pad), lambda i: (0, 0)),        # gamma
                pl.BlockSpec((1, c_pad), lambda i: (0, 0)),        # beta
            ] + extra_specs,
            out_specs=pl.BlockSpec((tile_m, c_pad), lambda i: (i, 0)),
        ),
        out_shape=jax.ShapeDtypeStruct((rows_pad, c_pad), jnp.float32),
        compiler_params=pltpu.CompilerParams(
            dimension_semantics=("parallel",),
            vmem_limit_bytes=_VMEM_LIMIT),
    )(y_p, stats, gamma_p, beta_p, *extra_inputs)

    return out_p[:rows, :cout].reshape(n, ho, wo, cout)


def max_pool(x_nhwc, *, kernel=3, stride=2, padding=1):
    """MaxPool2d(kernel_size=3, stride=2, padding=1) via a rows-tiled Pallas max reduction."""
    n, h, w, c = x_nhwc.shape
    xp = jnp.pad(x_nhwc.astype(jnp.float32),
                 ((0, 0), (padding, padding), (padding, padding), (0, 0)),
                 constant_values=-jnp.inf)
    ho = (h + 2 * padding - kernel) // stride + 1
    wo = (w + 2 * padding - kernel) // stride + 1
    rows = n * ho * wo
    kk = kernel * kernel

    c_pad = _round_up(c, _LANE)
    tile_m, rows_pad = _row_tiling(rows)

    patches = []
    for i in range(kernel):
        for j in range(kernel):
            p = jax.lax.slice(
                xp, (0, i, j, 0),
                (n, i + (ho - 1) * stride + 1, j + (wo - 1) * stride + 1, c),
                (1, stride, stride, 1))
            patches.append(p.reshape(1, rows, c))
    stacked = jnp.concatenate(patches, axis=0)                        # (kk, rows, c)
    stacked = jnp.pad(stacked, ((0, 0), (0, rows_pad - rows), (0, c_pad - c)))

    out_p = pl.pallas_call(
        _maxpool_kernel,
        grid_spec=pltpu.PrefetchScalarGridSpec(
            num_scalar_prefetch=0,
            grid=(rows_pad // tile_m,),
            in_specs=[pl.BlockSpec((kk, tile_m, c_pad), lambda i: (0, i, 0))],
            out_specs=pl.BlockSpec((tile_m, c_pad), lambda i: (i, 0)),
        ),
        out_shape=jax.ShapeDtypeStruct((rows_pad, c_pad), jnp.float32),
        compiler_params=pltpu.CompilerParams(
            dimension_semantics=("parallel",),
            vmem_limit_bytes=_VMEM_LIMIT),
    )(stacked)
    return out_p[:rows, :c].reshape(n, ho, wo, c)


# ------------------------- parameter initialization ------------------------- #

def _kaiming_normal_oihw(key, cout, cin, kh, kw):
    # torch.nn.init.kaiming_normal_(mode='fan_out', nonlinearity='relu')
    fan_out = cout * kh * kw
    std = (2.0 / fan_out) ** 0.5
    return jax.random.normal(key, (cout, cin, kh, kw), jnp.float32) * std


def init_resnet_encoder_params(key, *, in_channels, channels, layers):
    """Deterministic init matching ResNetEncoder.__init__ with BasicBlock (expansion=1)."""
    keys = iter(jax.random.split(key, 256))
    params = {}
    inplanes = channels[0]
    params["conv1"] = _kaiming_normal_oihw(next(keys), inplanes, in_channels, 7, 7)
    params["bn1"] = (jnp.ones(inplanes, jnp.float32), jnp.zeros(inplanes, jnp.float32))
    stages = []
    for stage_idx, (planes, n_blocks) in enumerate(zip(channels, layers)):
        stage_stride = 1 if stage_idx == 0 else 2
        blocks = []
        for b in range(n_blocks):
            blk_stride = stage_stride if b == 0 else 1
            blk = {
                "stride": blk_stride,
                "conv1": _kaiming_normal_oihw(next(keys), planes, inplanes, 3, 3),
                "bn1": (jnp.ones(planes, jnp.float32), jnp.zeros(planes, jnp.float32)),
                "conv2": _kaiming_normal_oihw(next(keys), planes, planes, 3, 3),
                "bn2": (jnp.ones(planes, jnp.float32), jnp.zeros(planes, jnp.float32)),
            }
            if blk_stride != 1 or inplanes != planes:    # BasicBlock.expansion == 1
                blk["downsample"] = (
                    _kaiming_normal_oihw(next(keys), planes, inplanes, 1, 1),
                    jnp.ones(planes, jnp.float32),
                    jnp.zeros(planes, jnp.float32),
                )
            else:
                blk["downsample"] = None
            blocks.append(blk)
            inplanes = planes
        stages.append(blocks)
    params["stages"] = stages
    return params


# -------------------------------- forward ----------------------------------- #

def basic_block(x_nhwc, blk):
    """torchvision BasicBlock forward (conv-bn-relu, conv-bn, +identity, relu)."""
    out = conv_bn_act(x_nhwc, blk["conv1"], *blk["bn1"],
                      stride=blk["stride"], padding=1, relu=True)
    if blk["downsample"] is not None:
        w_ds, g_ds, b_ds = blk["downsample"]
        identity = conv_bn_act(x_nhwc, w_ds, g_ds, b_ds,
                               stride=blk["stride"], padding=0, relu=False)
    else:
        identity = x_nhwc
    # residual add + final ReLU are fused into conv2's BN-apply pass
    out = conv_bn_act(out, blk["conv2"], *blk["bn2"],
                      stride=1, padding=1, relu=True, residual=identity)
    return out


def resnet_encoder_forward(x_nchw, params):
    """Mirrors ResNetEncoder.forward / get_stages: returns the per-stage feature list (NCHW)."""
    features = [x_nchw]                                   # stage 0: Identity
    x = jnp.transpose(x_nchw, (0, 2, 3, 1))               # NCHW -> NHWC
    # stage 1: conv1 (7x7 s2 p3, no bias) + bn1 + relu
    x = conv_bn_act(x, params["conv1"], *params["bn1"], stride=2, padding=3, relu=True)
    features.append(jnp.transpose(x, (0, 3, 1, 2)))
    # stage 2: maxpool (3x3 s2 p1) + layer1
    x = max_pool(x)
    for blk in params["stages"][0]:
        x = basic_block(x, blk)
    features.append(jnp.transpose(x, (0, 3, 1, 2)))
    # stages 3..: layer2..layerN (first block stride 2 w/ downsample)
    for blocks in params["stages"][1:]:
        for blk in blocks:
            x = basic_block(x, blk)
        features.append(jnp.transpose(x, (0, 3, 1, 2)))
    return features


# --------------------------------- main -------------------------------------- #

if __name__ == "__main__":
    key = jax.random.PRNGKey(0)
    k_x, k_p = jax.random.split(key)

    # Small ResNet config: block="BasicBlock", layers=[1, 1], channels=[8, 16],
    # in_channels=3, groups=1, width_per_group=64, norm_layer="BatchNorm".
    x = jax.random.normal(k_x, (2, 3, 16, 16), jnp.float32)   # NCHW, as in PyTorch
    params = init_resnet_encoder_params(k_p, in_channels=3, channels=[8, 16], layers=[1, 1])

    feats = resnet_encoder_forward(x, params)
    feats = jax.block_until_ready(feats)

    expected_shapes = [(2, 3, 16, 16), (2, 8, 8, 8), (2, 8, 4, 4), (2, 16, 2, 2)]
    got_shapes = [tuple(f.shape) for f in feats]
    assert got_shapes == expected_shapes, f"unexpected feature shapes: {got_shapes}"
    assert all(bool(jnp.all(jnp.isfinite(f))) for f in feats), "non-finite values in features"
    print("KERNEL_OK")
</pallas_src>

<mosaic_0001>
module attributes {stable_mosaic.version = 11 : i64} {
  func.func @_matmul_stats_kernel(%arg0: i32, %arg1: memref<128x256xbf16, #tpu.memory_space<vmem>>, %arg2: memref<256x128xbf16, #tpu.memory_space<vmem>>, %arg3: memref<128x128xf32, #tpu.memory_space<vmem>>, %arg4: memref<2x128xf32, #tpu.memory_space<vmem>>) attributes {dimension_semantics = [#tpu.dimension_semantics<arbitrary>], iteration_bounds = array<i64: 1>, scalar_prefetch = 0 : i64, scratch_operands = 0 : i64, tpu.core_type = #tpu.core_type<tc>, window_params = [{transform_indices = @transform_0, window_bounds = array<i64: 128, 256>}, {pipeline_mode = #tpu.pipeline_mode<synchronous>, transform_indices = @transform_1, window_bounds = array<i64: 256, 128>}, {transform_indices = @transform_2, window_bounds = array<i64: 128, 128>}, {pipeline_mode = #tpu.pipeline_mode<synchronous>, transform_indices = @transform_3, window_bounds = array<i64: 2, 128>}]} {
    %c0 = arith.constant 0 : index
    %c0_0 = arith.constant 0 : index
    %0 = vector.load %arg1[%c0, %c0_0] : memref<128x256xbf16, #tpu.memory_space<vmem>>, vector<128x256xbf16>
    %c0_1 = arith.constant 0 : index
    %c0_2 = arith.constant 0 : index
    %1 = vector.load %arg2[%c0_1, %c0_2] : memref<256x128xbf16, #tpu.memory_space<vmem>>, vector<256x128xbf16>
    %cst = arith.constant dense<0.000000e+00> : vector<128x128xf32>
    %2 = tpu.matmul %0, %1, %cst {dimension_numbers = #tpu.dot_dimension_numbers<[1], [0], [0], [1], [0, 0, 1, 1], [], []>} : vector<128x256xbf16>, vector<256x128xbf16>, vector<128x128xf32> -> vector<128x128xf32>
    %c0_3 = arith.constant 0 : index
    %c0_4 = arith.constant 0 : index
    %3 = vector.load %arg3[%c0_3, %c0_4] : memref<128x128xf32, #tpu.memory_space<vmem>>, vector<128x128xf32>
    tpu.vector_store %arg3[%c0_3, %c0_4], %2 {strides = array<i32>} : memref<128x128xf32, #tpu.memory_space<vmem>>, vector<128x128xf32>,
    %c0_i32 = arith.constant 0 : i32
    %4 = arith.cmpi eq, %arg0, %c0_i32 : i32
    %5 = arith.extui %4 : i1 to i32
    %c0_i32_5 = arith.constant 0 : i32
    %6 = arith.cmpi ne, %5, %c0_i32_5 : i32
    scf.if %6 {
      %cst_12 = arith.constant 0.000000e+00 : f32
      %16 = vector.broadcast %cst_12 : f32 to vector<2x128xf32>
      %c0_13 = arith.constant 0 : index
      %c0_14 = arith.constant 0 : index
      %17 = vector.load %arg4[%c0_13, %c0_14] : memref<2x128xf32, #tpu.memory_space<vmem>>, vector<2x128xf32>
      tpu.vector_store %arg4[%c0_13, %c0_14], %16 {strides = array<i32>} : memref<2x128xf32, #tpu.memory_space<vmem>>, vector<2x128xf32>,
    } else {
    }
    %cst_6 = arith.constant dense<0.000000e+00> : vector<128xf32>
    %7 = vector.multi_reduction <add>, %2, %cst_6 [0] : vector<128x128xf32> to vector<128xf32>
    %8 = vector.shape_cast %7 : vector<128xf32> to vector<1x128xf32>
    %9 = arith.mulf %2, %2 : vector<128x128xf32>
    %cst_7 = arith.constant dense<0.000000e+00> : vector<128xf32>
    %10 = vector.multi_reduction <add>, %9, %cst_7 [0] : vector<128x128xf32> to vector<128xf32>
    %11 = vector.shape_cast %10 : vector<128xf32> to vector<1x128xf32>
    %c0_8 = arith.constant 0 : index
    %c0_9 = arith.constant 0 : index
    %12 = vector.load %arg4[%c0_8, %c0_9] : memref<2x128xf32, #tpu.memory_space<vmem>>, vector<2x128xf32>
    %13 = tpu.concatenate %8, %11 in 0 : vector<1x128xf32>, vector<1x128xf32> -> vector<2x128xf32>
    %14 = arith.addf %12, %13 : vector<2x128xf32>
    %c0_10 = arith.constant 0 : index
    %c0_11 = arith.constant 0 : index
    %15 = vector.load %arg4[%c0_10, %c0_11] : memref<2x128xf32, #tpu.memory_space<vmem>>, vector<2x128xf32>
    tpu.vector_store %arg4[%c0_10, %c0_11], %14 {strides = array<i32>} : memref<2x128xf32, #tpu.memory_space<vmem>>, vector<2x128xf32>,
    return
  }
  func.func @transform_0(%arg0: i32) -> (i32, i32) {
    %c0_i32 = arith.constant 0 : i32
    %c0_i32_0 = arith.constant 0 : i32
    return %arg0, %c0_i32 : i32, i32
  }
  func.func @transform_1(%arg0: i32) -> (i32, i32) {
    %c0_i32 = arith.constant 0 : i32
    %c0_i32_0 = arith.constant 0 : i32
    %c0_i32_1 = arith.constant 0 : i32
    return %c0_i32, %c0_i32_0 : i32, i32
  }
  func.func @transform_2(%arg0: i32) -> (i32, i32) {
    %c0_i32 = arith.constant 0 : i32
    %c0_i32_0 = arith.constant 0 : i32
    return %arg0, %c0_i32 : i32, i32
  }
  func.func @transform_3(%arg0: i32) -> (i32, i32) {
    %c0_i32 = arith.constant 0 : i32
    %c0_i32_0 = arith.constant 0 : i32
    %c0_i32_1 = arith.constant 0 : i32
    return %c0_i32, %c0_i32_0 : i32, i32
  }
}

</mosaic_0001>

<bundles_post_ra>
// kernel: tpu_custom_call.1
= control target key start
LH: loop header
LB: loop body
LE: loop exit
PB: predicated region body
PF: predicated region fallthrough
CT: control target
= control target key end

     0   :  { %9 = vsyncpa [#allocation3], 0  ;;  %s855_s0 = inlined_call_operand.hbm [shape: bf16[128,256], index: 0, kind: input, shape index: {}]   ;;  %s856_s1 = inlined_call_operand.hbm [shape: bf16[256,128], index: 1, kind: input, shape index: {}]   ;;  %s857_s2 = inlined_call_operand.hbm [shape: f32[128,128], index: 2, kind: output, shape index: {0}]   ;;  %s858_s3 = inlined_call_operand.hbm [shape: f32[2,128], index: 3, kind: output, shape index: {1}]  }
   0x1   :  { %10 = vsyncpa [#allocation6], 0 }
   0x2   :  { %11 = vsyncpa [#allocation4], 0 }
   0x3   :  { %12 = vsyncpa [#allocation9], 0  ;;  %s17_s14 = sshll.u32 %s855_s0, 4  ;;  %s778_s15 = smov [#allocation2]   ;;  %s18_s14 = int_to_ptr.hbm [resolvable:$true] %s17_s14 }
   0x4   :  { %s19_s16 = sshll.u32 %s778_s15, 4  ;;  %s30_s19 = sshll.u32 %s856_s1, 4  ;;  %s20_s16 = int_to_ptr.vmem [resolvable:$true] %s19_s16  ;;  %s31_s19 = int_to_ptr.hbm [resolvable:$true] %s30_s19 }
   0x5   :  { %s779_s20 = smov 128   ;;  %s780_s21 = smov 8  }
   0x6   :  { %25 = dma.hbm_to_vmem [thread:$0]  %s18_s14, 2048, %s20_s16, [#allocation3], %s779_s20, %s779_s20, %s780_s21  }
   0x7   :  { %s781_s22 = smov [#allocation5]   ;;  %s782_s24 = smov 64  }
   0x8   :  { %s32_s23 = sshll.u32 %s781_s22, 4  ;;  %s783_s0 = smov 4   ;;  %s33_s23 = int_to_ptr.vmem [resolvable:$true] %s32_s23 }
   0x9   :  { %38 = dma.hbm_to_vmem [thread:$0]  %s31_s19, 2048, %s33_s23, [#allocation6], %s782_s24, %s782_s24, %s783_s0  }
   0xa   :  { %770 = dma.done.wait [#allocation3], 2048  }
   0xb   :  { %771 = vsyncadd [#allocation3], 4294965248 }
   0xc   :  { %772 = dma.done.wait [#allocation6], 2048  }
   0xd   :  { %773 = vsyncadd [#allocation6], 4294965248  ;;  %v640_v0 = vld [vmem:[#allocation5 + $0x38] sm:$0xff]  ;;  %v639_v2 = vld [vmem:[#allocation5 + $0x30] sm:$0xff]  ;;  %s785_s1 = smov [#allocation7]   ;;  %s459_s28 = sshll.u32 %s857_s2, 4  ;;  %s460_s28 = int_to_ptr.hbm [resolvable:$true] %s459_s28 }
   0xe   :  { %v648_v1 = vld [vmem:[#allocation5 + $0x78] sm:$0xff]  ;;  %271 = vmatpush.bf16.msra.mxu0 %v640_v0  ;;  %v647_v3 = vld [vmem:[#allocation5 + $0x70] sm:$0xff]  ;;  %649 = vmatpush.bf16.msra.mxu2 %v640_v0  ;;  %v638_v4 = vld [vmem:[#allocation5 + $0x28] sm:$0xff]  ;;  %s457_s25 = sshll.u32 %s785_s1, 4  ;;  %vm449_vm0 = vcmask 1040384   ;;  %s786_s2 = smov [#allocation8]   ;;  %s458_s25 = int_to_ptr.vmem [resolvable:$true] %s457_s25 }
   0xf   :  { %320 = vmatpush.bf16.msra.mxu1 %v648_v1  ;;  %657 = vmatpush.bf16.msra.mxu3 %v648_v1  ;;  %v646_v5 = vld [vmem:[#allocation5 + $0x68] sm:$0xff]  ;;  %v637_v6 = vld [vmem:[#allocation5 + $0x20] sm:$0xff]  ;;  %v636_v8 = vld [vmem:[#allocation5 + $0x18] sm:$0xff]  ;;  %s471_s29 = sshll.u32 %s786_s2, 4  ;;  %s473_s5 = sshll.u32 %s858_s3, 4  ;;  %s472_s29 = int_to_ptr.vmem [resolvable:$true] %s471_s29  ;;  %s474_s5 = int_to_ptr.hbm [resolvable:$true] %s473_s5 }
  0x10   :  { %v645_v7 = vld [vmem:[#allocation5 + $0x60] sm:$0xff]  ;;  %v644_v9 = vld [vmem:[#allocation5 + $0x58] sm:$0xff]  ;;  %v635_v10 = vld [vmem:[#allocation5 + $0x10] sm:$0xff] }
  0x11   :  { %v643_v11 = vld [vmem:[#allocation5 + $0x50] sm:$0xff]  ;;  %v634_v12 = vld [vmem:[#allocation5 + $0x8] sm:$0xff]  ;;  %v633_v14 = vld [vmem:[#allocation5] sm:$0xff] }
  0x12   :  { %272 = vmatpush.bf16.msra.mxu0 %v639_v2  ;;  %650 = vmatpush.bf16.msra.mxu2 %v639_v2  ;;  %v642_v13 = vld [vmem:[#allocation5 + $0x48] sm:$0xff]  ;;  %v641_v15 = vld [vmem:[#allocation5 + $0x40] sm:$0xff]  ;;  %v499_v28 = vld [vmem:[#allocation2 + $0x10] sm:$0xf] }
  0x13   :  { %321 = vmatpush.bf16.msra.mxu1 %v647_v3  ;;  %658 = vmatpush.bf16.msra.mxu3 %v647_v3  ;;  %v491_v16 = vld [vmem:[#allocation2] sm:$0xf]  ;;  %v618_v17 = vld [vmem:[#allocation2 + $0x4] sm:$0xf0]  ;;  %v617_v18 = vld [vmem:[#allocation2 + $0x4] sm:$0xf] }
  0x14   :  { %v493_v19 = vld [vmem:[#allocation2 + $0x8] sm:$0xf0]  ;;  %v523_v20 = vld [vmem:[#allocation2 + $0x40] sm:$0xf]  ;;  %v626_v21 = vld [vmem:[#allocation2 + $0x44] sm:$0xf0]  ;;  %v492_v24 = vor.u32 %v618_v17, %v491_v16 }
  0x15   :  { %v625_v22 = vld [vmem:[#allocation2 + $0x44] sm:$0xf]  ;;  %v525_v23 = vld [vmem:[#allocation2 + $0x48] sm:$0xf0]  ;;  %v496_v25 = vor.u32 %v617_v18, %v493_v19  ;;  %v524_v26 = vor.u32 %v626_v21, %v523_v20  ;;  %v620_v29 = vld [vmem:[#allocation2 + $0x14] sm:$0xf0] }
  0x16   :  { %273 = vmatpush.bf16.msra.mxu0 %v638_v4  ;;  %651 = vmatpush.bf16.msra.mxu2 %v638_v4  ;;  %v528_v27 = vor.u32 %v625_v22, %v525_v23  ;;  %v619_v30 = vld [vmem:[#allocation2 + $0x14] sm:$0xf]  ;;  %v501_v31 = vld [vmem:[#allocation2 + $0x18] sm:$0xf0]  ;;  %v531_v32 = vld [vmem:[#allocation2 + $0x50] sm:$0xf]  ;;  %v500_v36 = vor.u32 %v620_v29, %v499_v28 }
  0x17   :  { %322 = vmatpush.bf16.msra.mxu1 %v646_v5  ;;  %659 = vmatpush.bf16.msra.mxu3 %v646_v5  ;;  %v628_v33 = vld [vmem:[#allocation2 + $0x54] sm:$0xf0]  ;;  %v627_v34 = vld [vmem:[#allocation2 + $0x54] sm:$0xf]  ;;  %v533_v35 = vld [vmem:[#allocation2 + $0x58] sm:$0xf0]  ;;  %v504_v37 = vor.u32 %v619_v30, %v501_v31 }
  0x18   :  { %v532_v38 = vor.u32 %v628_v33, %v531_v32  ;;  %v536_v39 = vor.u32 %v627_v34, %v533_v35  ;;  %v507_v40 = vld [vmem:[#allocation2 + $0x20] sm:$0xf]  ;;  %v622_v41 = vld [vmem:[#allocation2 + $0x24] sm:$0xf0]  ;;  %v621_v42 = vld [vmem:[#allocation2 + $0x24] sm:$0xf] }
  0x19   :  { %v509_v43 = vld [vmem:[#allocation2 + $0x28] sm:$0xf0]  ;;  %v539_v44 = vld [vmem:[#allocation2 + $0x60] sm:$0xf]  ;;  %v630_v45 = vld [vmem:[#allocation2 + $0x64] sm:$0xf0]  ;;  %v508_v48 = vor.u32 %v622_v41, %v507_v40 }
  0x1a   :  { %274 = vmatpush.bf16.msra.mxu0 %v637_v6  ;;  %652 = vmatpush.bf16.msra.mxu2 %v637_v6  ;;  %v629_v46 = vld [vmem:[#allocation2 + $0x64] sm:$0xf]  ;;  %v541_v47 = vld [vmem:[#allocation2 + $0x68] sm:$0xf0]  ;;  %v512_v49 = vor.u32 %v621_v42, %v509_v43  ;;  %v540_v50 = vor.u32 %v630_v45, %v539_v44  ;;  %v515_v52 = vld [vmem:[#allocation2 + $0x30] sm:$0xf] }
  0x1b   :  { %323 = vmatpush.bf16.msra.mxu1 %v645_v7  ;;  %660 = vmatpush.bf16.msra.mxu3 %v645_v7  ;;  %v544_v51 = vor.u32 %v629_v46, %v541_v47  ;;  %v624_v53 = vld [vmem:[#allocation2 + $0x34] sm:$0xf0]  ;;  %v623_v54 = vld [vmem:[#allocation2 + $0x34] sm:$0xf]  ;;  %v517_v55 = vld [vmem:[#allocation2 + $0x38] sm:$0xf0] }
  0x1c   :  { %v547_v56 = vld [vmem:[#allocation2 + $0x70] sm:$0xf]  ;;  %v632_v57 = vld [vmem:[#allocation2 + $0x74] sm:$0xf0]  ;;  %v631_v58 = vld [vmem:[#allocation2 + $0x74] sm:$0xf]  ;;  %v516_v60 = vor.u32 %v624_v53, %v515_v52  ;;  %v520_v61 = vor.u32 %v623_v54, %v517_v55 }
  0x1d   :  { %v549_v59 = vld [vmem:[#allocation2 + $0x78] sm:$0xf0]  ;;  %v548_v62 = vor.u32 %v632_v57, %v547_v56 }
  0x1e   :  { %275 = vmatpush.bf16.msra.mxu0 %v636_v8  ;;  %653 = vmatpush.bf16.msra.mxu2 %v636_v8  ;;  %v552_v63 = vor.u32 %v631_v58, %v549_v59 }
  0x1f   :  { %324 = vmatpush.bf16.msra.mxu1 %v644_v9  ;;  %661 = vmatpush.bf16.msra.mxu3 %v644_v9 }
  0x22   :  { %276 = vmatpush.bf16.msra.mxu0 %v635_v10  ;;  %654 = vmatpush.bf16.msra.mxu2 %v635_v10 }
  0x23   :  { %325 = vmatpush.bf16.msra.mxu1 %v643_v11  ;;  %662 = vmatpush.bf16.msra.mxu3 %v643_v11 }
  0x26   :  { %277 = vmatpush.bf16.msra.mxu0 %v634_v12  ;;  %655 = vmatpush.bf16.msra.mxu2 %v634_v12 }
  0x27   :  { %326 = vmatpush.bf16.msra.mxu1 %v642_v13  ;;  %663 = vmatpush.bf16.msra.mxu3 %v642_v13 }
  0x2a   :  { %278 = vmatpush.bf16.msra.mxu0 %v633_v14  ;;  %656 = vmatpush.bf16.msra.mxu2 %v633_v14 }
  0x2b   :  { %327 = vmatpush.bf16.msra.mxu1 %v641_v15  ;;  %664 = vmatpush.bf16.msra.mxu3 %v641_v15 }
  0x2d   :  { %279 = vmatmul.bf16.vlgmr.msra.gmra.mxu0 %v492_v24  ;;  %299 = vmatmul.bf16.vlgmr.msra.gmra.mxu2 %v524_v26 }
  0x2e   :  { %328 = vmatmul.bf16.vlgmr.msra.gmra.mxu1 %v496_v25  ;;  %348 = vmatmul.bf16.vlgmr.msra.gmra.mxu3 %v528_v27 }
  0x3d   :  { %284 = vmatmul.bf16.gmra.mxu0 %v500_v36  ;;  %304 = vmatmul.bf16.gmra.mxu2 %v532_v38 }
  0x3e   :  { %333 = vmatmul.bf16.gmra.mxu1 %v504_v37  ;;  %353 = vmatmul.bf16.gmra.mxu3 %v536_v39 }
  0x4d   :  { %289 = vmatmul.bf16.gmra.mxu0 %v508_v48  ;;  %309 = vmatmul.bf16.gmra.mxu2 %v540_v50 }
  0x4e   :  { %338 = vmatmul.bf16.gmra.mxu1 %v512_v49  ;;  %358 = vmatmul.bf16.gmra.mxu3 %v544_v51  ;;  %v784_v49 = vmov 0.0  }
  0x4f   :  { %389 = vst [vmem:[#allocation8] sm:$0x3] %v784_v49 }
  0x5d   :  { %294 = vmatmul.bf16.gmra.mxu0 %v516_v60  ;;  %314 = vmatmul.bf16.gmra.mxu2 %v548_v62 }
  0x5e   :  { %343 = vmatmul.bf16.gmra.mxu1 %v520_v61  ;;  %363 = vmatmul.bf16.gmra.mxu3 %v552_v63 }
  0xaa   :  { %v280_v0 = vpop.f32.mrf.mxu0 }
  0xab   :  { %v329_v1 = vpop.f32.mrf.mxu1 }
  0xac   :  { %v330_v2 = vadd.f32 %v329_v1, %v280_v0 }
  0xae   :  { %369 = vst [vmem:[#allocation7] sm:$0xff] %v330_v2  ;;  %v411_v34 = vmul.f32 %v330_v2, %v330_v2 }
  0xb0   :  { %v300_v3 = vpop.f32.mrf.mxu2 }
  0xb1   :  { %v349_v4 = vpop.f32.mrf.mxu3 }
  0xb2   :  { %v282_v5 = vpop.f32.mrf.mxu0  ;;  %v816_v7 = vadd.f32 %v349_v4, %v300_v3 }
  0xb3   :  { %v331_v6 = vpop.f32.mrf.mxu1 }
  0xb4   :  { %v332_v8 = vadd.f32 %v331_v6, %v282_v5  ;;  %377 = vst [vmem:[#allocation7 + $0x40] sm:$0xff] %v816_v7  ;;  %v419_v3 = vmul.f32 %v816_v7, %v816_v7 }
  0xb6   :  { %370 = vst [vmem:[#allocation7 + $0x8] sm:$0xff] %v332_v8  ;;  %v412_v33 = vmul.f32 %v332_v8, %v332_v8  ;;  %v390_v35 = vadd.f32 %v332_v8, %v330_v2 }
  0xb8   :  { %v302_v9 = vpop.f32.mrf.mxu2  ;;  %v427_v42 = vadd.f32 %v412_v33, %v411_v34 }
  0xb9   :  { %v351_v10 = vpop.f32.mrf.mxu3 }
  0xba   :  { %v285_v11 = vpop.f32.mrf.mxu0  ;;  %v819_v13 = vadd.f32 %v351_v10, %v302_v9 }
  0xbb   :  { %v334_v12 = vpop.f32.mrf.mxu1 }
  0xbc   :  { %v335_v14 = vadd.f32 %v334_v12, %v285_v11  ;;  %378 = vst [vmem:[#allocation7 + $0x48] sm:$0xff] %v819_v13  ;;  %v420_v6 = vmul.f32 %v819_v13, %v819_v13 }
  0xbe   :  { %371 = vst [vmem:[#allocation7 + $0x10] sm:$0xff] %v335_v14  ;;  %v413_v36 = vmul.f32 %v335_v14, %v335_v14  ;;  %v391_v43 = vadd.f32 %v390_v35, %v335_v14 }
  0xc0   :  { %v305_v15 = vpop.f32.mrf.mxu2  ;;  %v428_v46 = vadd.f32 %v427_v42, %v413_v36 }
  0xc1   :  { %v354_v16 = vpop.f32.mrf.mxu3 }
  0xc2   :  { %v287_v17 = vpop.f32.mrf.mxu0  ;;  %v822_v19 = vadd.f32 %v354_v16, %v305_v15 }
  0xc3   :  { %v336_v18 = vpop.f32.mrf.mxu1 }
  0xc4   :  { %v337_v20 = vadd.f32 %v336_v18, %v287_v17  ;;  %379 = vst [vmem:[#allocation7 + $0x50] sm:$0xff] %v822_v19 }
  0xc6   :  { %372 = vst [vmem:[#allocation7 + $0x18] sm:$0xff] %v337_v20  ;;  %v414_v44 = vmul.f32 %v337_v20, %v337_v20  ;;  %v392_v47 = vadd.f32 %v391_v43, %v337_v20  ;;  %v448_v43 = vld [vmem:[#allocation8] sm:$0x3] }
  0xc8   :  { %v307_v21 = vpop.f32.mrf.mxu2  ;;  %v429_v50 = vadd.f32 %v428_v46, %v414_v44 }
  0xc9   :  { %v356_v22 = vpop.f32.mrf.mxu3 }
  0xca   :  { %v290_v23 = vpop.f32.mrf.mxu0  ;;  %v825_v25 = vadd.f32 %v356_v22, %v307_v21 }
  0xcb   :  { %v339_v24 = vpop.f32.mrf.mxu1 }
  0xcc   :  { %v340_v26 = vadd.f32 %v339_v24, %v290_v23  ;;  %380 = vst [vmem:[#allocation7 + $0x58] sm:$0xff] %v825_v25  ;;  %v422_v16 = vmul.f32 %v825_v25, %v825_v25 }
  0xce   :  { %373 = vst [vmem:[#allocation7 + $0x20] sm:$0xff] %v340_v26  ;;  %v415_v48 = vmul.f32 %v340_v26, %v340_v26  ;;  %v393_v51 = vadd.f32 %v392_v47, %v340_v26 }
  0xd0   :  { %v310_v27 = vpop.f32.mrf.mxu2  ;;  %v430_v53 = vadd.f32 %v429_v50, %v415_v48 }
  0xd1   :  { %v359_v28 = vpop.f32.mrf.mxu3 }
  0xd2   :  { %v292_v29 = vpop.f32.mrf.mxu0  ;;  %v828_v31 = vadd.f32 %v359_v28, %v310_v27 }
  0xd3   :  { %v341_v30 = vpop.f32.mrf.mxu1 }
  0xd4   :  { %v342_v32 = vadd.f32 %v341_v30, %v292_v29  ;;  %381 = vst [vmem:[#allocation7 + $0x60] sm:$0xff] %v828_v31 }
  0xd6   :  { %374 = vst [vmem:[#allocation7 + $0x28] sm:$0xff] %v342_v32  ;;  %v416_v52 = vmul.f32 %v342_v32, %v342_v32  ;;  %v394_v54 = vadd.f32 %v393_v51, %v342_v32 }
  0xd8   :  { %v312_v37 = vpop.f32.mrf.mxu2  ;;  %v431_v61 = vadd.f32 %v430_v53, %v416_v52 }
  0xd9   :  { %v361_v38 = vpop.f32.mrf.mxu3 }
  0xda   :  { %v295_v39 = vpop.f32.mrf.mxu0  ;;  %v362_v41 = vadd.f32 %v361_v38, %v312_v37 }
  0xdb   :  { %v344_v40 = vpop.f32.mrf.mxu1 }
  0xdc   :  { %v345_v45 = vadd.f32 %v344_v40, %v295_v39  ;;  %382 = vst [vmem:[#allocation7 + $0x68] sm:$0xff] %v362_v41  ;;  %v424_v22 = vmul.f32 %v362_v41, %v362_v41 }
  0xde   :  { %375 = vst [vmem:[#allocation7 + $0x30] sm:$0xff] %v345_v45  ;;  %v417_v55 = vmul.f32 %v345_v45, %v345_v45  ;;  %v395_v62 = vadd.f32 %v394_v54, %v345_v45 }
  0xe0   :  { %v315_v56 = vpop.f32.mrf.mxu2  ;;  %v432_v0 = vadd.f32 %v431_v61, %v417_v55 }
  0xe1   :  { %v364_v57 = vpop.f32.mrf.mxu3 }
  0xe2   :  { %v297_v58 = vpop.f32.mrf.mxu0  ;;  %v365_v60 = vadd.f32 %v364_v57, %v315_v56 }
  0xe3   :  { %v346_v59 = vpop.f32.mrf.mxu1 }
  0xe4   :  { %v347_v63 = vadd.f32 %v346_v59, %v297_v58  ;;  %383 = vst [vmem:[#allocation7 + $0x70] sm:$0xff] %v365_v60  ;;  %v425_v26 = vmul.f32 %v365_v60, %v365_v60 }
  0xe6   :  { %376 = vst [vmem:[#allocation7 + $0x38] sm:$0xff] %v347_v63  ;;  %v396_v1 = vadd.f32 %v395_v62, %v347_v63  ;;  %v418_v2 = vmul.f32 %v347_v63, %v347_v63 }
  0xe8   :  { %v397_v4 = vadd.f32 %v396_v1, %v816_v7  ;;  %v433_v5 = vadd.f32 %v432_v0, %v418_v2  ;;  %v317_v10 = vpop.f32.mrf.mxu2  ;;  %v421_v7 = vmul.f32 %v822_v19, %v822_v19 }
  0xe9   :  { %v366_v11 = vpop.f32.mrf.mxu3 }
  0xea   :  { %v398_v8 = vadd.f32 %v397_v4, %v819_v13  ;;  %v434_v9 = vadd.f32 %v433_v5, %v419_v3  ;;  %v367_v12 = vadd.f32 %v366_v11, %v317_v10  ;;  %v423_v13 = vmul.f32 %v828_v31, %v828_v31 }
  0xec   :  { %v399_v14 = vadd.f32 %v398_v8, %v822_v19  ;;  %v435_v15 = vadd.f32 %v434_v9, %v420_v6  ;;  %384 = vst [vmem:[#allocation7 + $0x78] sm:$0xff] %v367_v12  ;;  %v426_v30 = vmul.f32 %v367_v12, %v367_v12 }
  0xed   :  { %465 = dma.vmem_to_hbm [thread:$0]  %s458_s25, 2048, %s460_s28, [#allocation4], %s779_s20, %s779_s20, %s780_s21  }
  0xee   :  { %v436_v17 = vadd.f32 %v435_v15, %v421_v7  ;;  %v400_v18 = vadd.f32 %v399_v14, %v825_v25 }
  0xf0   :  { %v401_v20 = vadd.f32 %v400_v18, %v828_v31  ;;  %v437_v21 = vadd.f32 %v436_v17, %v422_v16 }
  0xf2   :  { %v402_v19 = vadd.f32 %v401_v20, %v362_v41  ;;  %v438_v23 = vadd.f32 %v437_v21, %v423_v13 }
  0xf4   :  { %v403_v24 = vadd.f32 %v402_v19, %v365_v60  ;;  %v439_v27 = vadd.f32 %v438_v23, %v424_v22 }
  0xf6   :  { %v440_v28 = vadd.f32 %v439_v27, %v425_v26  ;;  %v404_v29 = vadd.f32 %v403_v24, %v367_v12 }
  0xf8   :  { %v405_v25 = vrot.slane %v404_v29, 4  ;;  %v441_v32 = vadd.f32 %v440_v28, %v426_v30 }
  0xfa   :  { %v406_v33 = vadd.f32 %v405_v25, %v404_v29  ;;  %v442_v34 = vrot.slane %v441_v32, 4 }
  0xfc   :  { %v407_v35 = vrot.slane %v406_v33, 2  ;;  %v443_v36 = vadd.f32 %v442_v34, %v441_v32 }
  0xfe   :  { %v408_v37 = vadd.f32 %v407_v35, %v406_v33  ;;  %v444_v38 = vrot.slane %v443_v36, 2 }
 0x100   :  { %v409_v39 = vrot.slane %v408_v37, 1  ;;  %v445_v31 = vadd.f32 %v444_v38, %v443_v36 }
 0x102   :  { %v446_v40 = vrot.slane %v445_v31, 1  ;;  %v410_v41 = vadd.f32 %v409_v39, %v408_v37 }
 0x104   :  { %v447_v42 = vadd.f32 %v446_v40, %v445_v31 }
 0x106   :  { %v450_v44 = vsel %vm449_vm0, %v410_v41, %v447_v42 }
 0x107   :  { %v451_v45 = vadd.f32 %v450_v44, %v448_v43 }
 0x109   :  { %452 = vst [vmem:[#allocation8] sm:$0x3] %v451_v45 }
 0x10a   :  { %476 = dma.vmem_to_hbm [thread:$0]  %s472_s29, 32, %s474_s5, [#allocation9]  }
 0x10b   :  { %774 = dma.done.wait [#allocation4], 2048  }
 0x10c   :  { %775 = vsyncadd [#allocation4], 4294965248 }
 0x10d   :  { %776 = dma.done.wait [#allocation9], 32  }
 0x10e   :  { %777 = vsyncadd [#allocation9], 4294967264 }
 0x10f   :  { %485 = vsyncpa [#allocation3], 1 }
 0x110   :  { %486 = vsyncpa [#allocation6], 1 }
 0x111   :  { %487 = vsyncpa [#allocation4], 1 }
 0x112   :  { %488 = vsyncpa [#allocation9], 1 }

</bundles_post_ra>
